<compile_context>
chip_gen: v5e
topology: v5e:2x2
jax: 0.10.0
libtpu: 0.0.40
codegen_flags: <defaults>
</compile_context>

<pallas_src>
import functools

import jax
import jax.numpy as jnp
from jax.experimental import pallas as pl
from jax.experimental.pallas import tpu as pltpu


def _round_up(a: int, b: int) -> int:
    return ((a + b - 1) // b) * b


def _pick_tiles(M: int, K: int, N: int, x_itemsize: int, w_itemsize: int):
    """MXU/lane-aligned tile sizes sized to the problem, bounded by VMEM."""
    # Sublane multiple: 8 for f32, 16 for bf16, 32 for int8/fp8 (packed rows).
    sub = max(8, 32 // max(1, x_itemsize))
    tm = min(512, _round_up(M, sub))
    tn = min(512, _round_up(N, 128))
    tk = min(1024, _round_up(K, 128))

    def footprint(tm, tk, tn):
        return (
            2 * tm * tk * x_itemsize        # x tile, double buffered
            + 2 * tk * tn * w_itemsize      # w tile, double buffered
            + 2 * tn * 4                    # bias tile (f32), double buffered
            + 2 * tm * tn * x_itemsize      # out tile, double buffered
            + tm * tn * 4                   # f32 accumulator scratch
        )

    budget = 20 * 1024 * 1024  # leave headroom under v7x scoped VMEM
    # Shrink K first (cheapest: only lengthens the reduction loop), then M/N.
    while footprint(tm, tk, tn) > budget and tk > 512:
        tk //= 2
    while footprint(tm, tk, tn) > budget and (tm > 128 or tn > 128):
        if tm >= tn and tm > 128:
            tm //= 2
        elif tn > 128:
            tn //= 2
    return tm, tk, tn


def _gemm_bias_kernel(x_ref, w_ref, b_ref, o_ref, acc_ref):
    """One (tm, tn) output tile, accumulated over the K grid axis.

    x_ref: (tm, tk)   activation tile
    w_ref: (tk, tn)   shared weight tile (already [in, out] layout)
    b_ref: (1,  tn)   shared bias tile (f32)
    o_ref: (tm, tn)   output tile
    acc_ref: (tm, tn) f32 accumulator scratch (resident across the K axis)
    """
    k = pl.program_id(2)

    @pl.when(k == 0)
    def _():
        acc_ref[...] = jnp.zeros_like(acc_ref)

    acc_ref[...] += jnp.dot(
        x_ref[...], w_ref[...], preferred_element_type=jnp.float32
    )

    @pl.when(k == pl.num_programs(2) - 1)
    def _():
        o_ref[...] = (acc_ref[...] + b_ref[...]).astype(o_ref.dtype)


@functools.partial(jax.jit, static_argnames=())
def _module_parallel_linear_impl(x_parallel, weight, bias):
    P = len(x_parallel)
    B, S, H = x_parallel[0].shape
    N = weight.shape[0]
    M = P * B * S
    dtype = x_parallel[0].dtype
    itemsize = jnp.dtype(dtype).itemsize

    # Collapse all parallel branches into one GEMM operand (single concat).
    x2d = jnp.stack(x_parallel, axis=0).reshape(M, H)
    # Pre-transpose the weight once (wrapper-side) so the kernel does x @ w.
    w_t = jnp.transpose(weight)                       # [H, N]
    b2d = bias.astype(jnp.float32).reshape(1, N)      # f32 bias add on the acc

    tm, tk, tn = _pick_tiles(M, H, N, itemsize, jnp.dtype(weight.dtype).itemsize)

    M_pad = _round_up(M, tm)
    K_pad = _round_up(H, tk)
    N_pad = _round_up(N, tn)

    if (M_pad, K_pad) != (M, H):
        x2d = jnp.pad(x2d, ((0, M_pad - M), (0, K_pad - H)))
    if (K_pad, N_pad) != (H, N):
        w_t = jnp.pad(w_t, ((0, K_pad - H), (0, N_pad - N)))
    if N_pad != N:
        b2d = jnp.pad(b2d, ((0, 0), (0, N_pad - N)))

    grid = (M_pad // tm, N_pad // tn, K_pad // tk)

    cost = pl.CostEstimate(
        flops=2 * M_pad * K_pad * N_pad,
        transcendentals=0,
        bytes_accessed=(
            x2d.size * x2d.dtype.itemsize
            + w_t.size * w_t.dtype.itemsize
            + b2d.size * b2d.dtype.itemsize
            + M_pad * N_pad * itemsize
        ),
    )

    out = pl.pallas_call(
        _gemm_bias_kernel,
        out_shape=jax.ShapeDtypeStruct((M_pad, N_pad), dtype),
        grid_spec=pltpu.PrefetchScalarGridSpec(
            num_scalar_prefetch=0,
            grid=grid,
            in_specs=[
                pl.BlockSpec((tm, tk), lambda i, j, k: (i, k)),
                pl.BlockSpec((tk, tn), lambda i, j, k: (k, j)),
                pl.BlockSpec((1, tn), lambda i, j, k: (0, j)),
            ],
            out_specs=pl.BlockSpec((tm, tn), lambda i, j, k: (i, j)),
            scratch_shapes=[pltpu.VMEM((tm, tn), jnp.float32)],
        ),
        compiler_params=pltpu.CompilerParams(
            dimension_semantics=("parallel", "parallel", "arbitrary"),
            vmem_limit_bytes=32 * 1024 * 1024,
        ),
        cost_estimate=cost,
    )(x2d, w_t, b2d)

    out = out[:M, :N].reshape(P, B, S, N)
    # ModuleParallel semantics: return a list, one tensor per branch.
    return [out[p] for p in range(P)]


def module_parallel_linear(x_parallel, weight, bias):
    """Applies the same Linear(H->N) to every tensor in `x_parallel`.

    x_parallel: list of arrays, each [B, S, H] (all branches same shape)
    weight:     [N, H]   (PyTorch nn.Linear layout)
    bias:       [N]
    returns:    list of arrays, each [B, S, N]
    """
    return _module_parallel_linear_impl(list(x_parallel), weight, bias)


if __name__ == "__main__":
    key = jax.random.PRNGKey(0)
    P, B, S, H = 3, 2, 8, 32  # 3 parallel branches, batch=2, seq=8, hidden=32

    k_w, k_b, *k_xs = jax.random.split(key, 2 + P)
    # Deterministic synthetic nn.Linear(H, H) parameters.
    weight = jax.random.normal(k_w, (H, H), dtype=jnp.float32) * 0.02
    bias = jax.random.normal(k_b, (H,), dtype=jnp.float32) * 0.02

    x_parallel = [jax.random.normal(k, (B, S, H), dtype=jnp.float32) for k in k_xs]

    outs = module_parallel_linear(x_parallel, weight, bias)
    outs = [jax.block_until_ready(o) for o in outs]

    # Reference: plain-JAX per-branch Linear (same semantics as the PyTorch
    # list comprehension [self.module(x) for x in x_parallel]).
    refs = [x @ weight.T + bias for x in x_parallel]
    for o, r in zip(outs, refs):
        assert o.shape == r.shape
        assert jnp.allclose(o, r, atol=1e-5, rtol=1e-5)

    print("KERNEL_OK")
</pallas_src>

<mosaic_0001>
module attributes {stable_mosaic.version = 11 : i64} {
  func.func @_gemm_bias_kernel(%arg0: i32, %arg1: i32, %arg2: i32, %arg3: memref<48x128xf32, #tpu.memory_space<vmem>>, %arg4: memref<128x128xf32, #tpu.memory_space<vmem>>, %arg5: memref<1x128xf32, #tpu.memory_space<vmem>>, %arg6: memref<48x128xf32, #tpu.memory_space<vmem>>, %arg7: memref<48x128xf32, #tpu.memory_space<vmem>>) attributes {dimension_semantics = [#tpu.dimension_semantics<parallel>, #tpu.dimension_semantics<parallel>, #tpu.dimension_semantics<arbitrary>], iteration_bounds = array<i64: 1, 1, 1>, scalar_prefetch = 0 : i64, scratch_operands = 1 : i64, tpu.core_type = #tpu.core_type<tc>, window_params = [{transform_indices = @transform_0, window_bounds = array<i64: 48, 128>}, {transform_indices = @transform_1, window_bounds = array<i64: 128, 128>}, {transform_indices = @transform_2, window_bounds = array<i64: 1, 128>}, {transform_indices = @transform_3, window_bounds = array<i64: 48, 128>}]} {
    %c0_i32 = arith.constant 0 : i32
    %0 = arith.cmpi eq, %arg2, %c0_i32 : i32
    %1 = arith.extui %0 : i1 to i32
    %c0_i32_0 = arith.constant 0 : i32
    %2 = arith.cmpi ne, %1, %c0_i32_0 : i32
    scf.if %2 {
      %cst_10 = arith.constant 0.000000e+00 : f32
      %12 = vector.broadcast %cst_10 : f32 to vector<48x128xf32>
      %c0_11 = arith.constant 0 : index
      %c0_12 = arith.constant 0 : index
      %13 = vector.load %arg7[%c0_11, %c0_12] : memref<48x128xf32, #tpu.memory_space<vmem>>, vector<48x128xf32>
      tpu.vector_store %arg7[%c0_11, %c0_12], %12 {strides = array<i32>} : memref<48x128xf32, #tpu.memory_space<vmem>>, vector<48x128xf32>,
    } else {
    }
    %c0 = arith.constant 0 : index
    %c0_1 = arith.constant 0 : index
    %3 = vector.load %arg7[%c0, %c0_1] : memref<48x128xf32, #tpu.memory_space<vmem>>, vector<48x128xf32>
    %c0_2 = arith.constant 0 : index
    %c0_3 = arith.constant 0 : index
    %4 = vector.load %arg3[%c0_2, %c0_3] : memref<48x128xf32, #tpu.memory_space<vmem>>, vector<48x128xf32>
    %c0_4 = arith.constant 0 : index
    %c0_5 = arith.constant 0 : index
    %5 = vector.load %arg4[%c0_4, %c0_5] : memref<128x128xf32, #tpu.memory_space<vmem>>, vector<128x128xf32>
    %cst = arith.constant dense<0.000000e+00> : vector<48x128xf32>
    %6 = tpu.matmul %4, %5, %cst {dimension_numbers = #tpu.dot_dimension_numbers<[1], [0], [0], [1], [0, 0, 1, 1], [], []>} : vector<48x128xf32>, vector<128x128xf32>, vector<48x128xf32> -> vector<48x128xf32>
    %7 = arith.addf %3, %6 : vector<48x128xf32>
    %c0_6 = arith.constant 0 : index
    %c0_7 = arith.constant 0 : index
    %8 = vector.load %arg7[%c0_6, %c0_7] : memref<48x128xf32, #tpu.memory_space<vmem>>, vector<48x128xf32>
    tpu.vector_store %arg7[%c0_6, %c0_7], %7 {strides = array<i32>} : memref<48x128xf32, #tpu.memory_space<vmem>>, vector<48x128xf32>,
    %c0_i32_8 = arith.constant 0 : i32
    %9 = arith.cmpi eq, %arg2, %c0_i32_8 : i32
    %10 = arith.extui %9 : i1 to i32
    %c0_i32_9 = arith.constant 0 : i32
    %11 = arith.cmpi ne, %10, %c0_i32_9 : i32
    scf.if %11 {
      %c0_10 = arith.constant 0 : index
      %c0_11 = arith.constant 0 : index
      %12 = vector.load %arg7[%c0_10, %c0_11] : memref<48x128xf32, #tpu.memory_space<vmem>>, vector<48x128xf32>
      %c0_12 = arith.constant 0 : index
      %c0_13 = arith.constant 0 : index
      %13 = vector.load %arg5[%c0_12, %c0_13] : memref<1x128xf32, #tpu.memory_space<vmem>>, vector<1x128xf32>
      %14 = vector.broadcast %13 : vector<1x128xf32> to vector<48x128xf32>
      %15 = arith.addf %12, %14 : vector<48x128xf32>
      %c0_14 = arith.constant 0 : index
      %c0_15 = arith.constant 0 : index
      %16 = vector.load %arg6[%c0_14, %c0_15] : memref<48x128xf32, #tpu.memory_space<vmem>>, vector<48x128xf32>
      tpu.vector_store %arg6[%c0_14, %c0_15], %15 {strides = array<i32>} : memref<48x128xf32, #tpu.memory_space<vmem>>, vector<48x128xf32>,
    } else {
    }
    return
  }
  func.func @transform_0(%arg0: i32, %arg1: i32, %arg2: i32) -> (i32, i32) {
    %c0_i32 = arith.constant 0 : i32
    return %arg0, %arg2 : i32, i32
  }
  func.func @transform_1(%arg0: i32, %arg1: i32, %arg2: i32) -> (i32, i32) {
    %c0_i32 = arith.constant 0 : i32
    return %arg2, %arg1 : i32, i32
  }
  func.func @transform_2(%arg0: i32, %arg1: i32, %arg2: i32) -> (i32, i32) {
    %c0_i32 = arith.constant 0 : i32
    %c0_i32_0 = arith.constant 0 : i32
    return %c0_i32, %arg1 : i32, i32
  }
  func.func @transform_3(%arg0: i32, %arg1: i32, %arg2: i32) -> (i32, i32) {
    %c0_i32 = arith.constant 0 : i32
    return %arg0, %arg1 : i32, i32
  }
}

</mosaic_0001>

<bundles_post_ra>
// kernel: _module_parallel_linear_impl.1
= control target key start
LH: loop header
LB: loop body
LE: loop exit
PB: predicated region body
PF: predicated region fallthrough
CT: control target
= control target key end

     0   :  { %s284_s1 = inlined_call_operand.vmem [shape: f32[128,128], index: 1, kind: input, shape index: {}]   ;;  %s285_s2 = inlined_call_operand.vmem [shape: f32[1,128], index: 2, kind: input, shape index: {}]   ;;  %s286_s0 = inlined_call_operand.vmem [shape: f32[48,128], index: 0, kind: input, shape index: {}]   ;;  %s287_s3 = inlined_call_operand.vmem [shape: f32[48,128], index: 3, kind: output, shape index: {}]  }
   0x1   :  { %v51_v0 = vld [vmem:[%s284_s1 + $0x78] sm:$0xff]  ;;  %v50_v1 = vld [vmem:[%s284_s1 + $0x70] sm:$0xff]  ;;  %v49_v2 = vld [vmem:[%s284_s1 + $0x68] sm:$0xff] }
   0x2   :  { %129 = vmatpush.msra.mxu2 %v51_v0  ;;  %130 = vmatpush.msra.mxu3 %v51_v0  ;;  %v48_v3 = vld [vmem:[%s284_s1 + $0x60] sm:$0xff]  ;;  %v47_v4 = vld [vmem:[%s284_s1 + $0x58] sm:$0xff]  ;;  %v46_v5 = vld [vmem:[%s284_s1 + $0x50] sm:$0xff] }
   0x3   :  { %52 = vmatpush.msra.mxu0 %v51_v0  ;;  %128 = vmatpush.msra.mxu1 %v51_v0  ;;  %v45_v6 = vld [vmem:[%s284_s1 + $0x48] sm:$0xff]  ;;  %v44_v7 = vld [vmem:[%s284_s1 + $0x40] sm:$0xff]  ;;  %v43_v8 = vld [vmem:[%s284_s1 + $0x38] sm:$0xff] }
   0x4   :  { %132 = vmatpush.msra.mxu2 %v50_v1  ;;  %133 = vmatpush.msra.mxu3 %v50_v1  ;;  %v42_v9 = vld [vmem:[%s284_s1 + $0x30] sm:$0xff]  ;;  %v41_v10 = vld [vmem:[%s284_s1 + $0x28] sm:$0xff]  ;;  %v40_v11 = vld [vmem:[%s284_s1 + $0x20] sm:$0xff] }
   0x5   :  { %53 = vmatpush.msra.mxu0 %v50_v1  ;;  %131 = vmatpush.msra.mxu1 %v50_v1  ;;  %v39_v12 = vld [vmem:[%s284_s1 + $0x18] sm:$0xff]  ;;  %v38_v13 = vld [vmem:[%s284_s1 + $0x10] sm:$0xff]  ;;  %v37_v14 = vld [vmem:[%s284_s1 + $0x8] sm:$0xff] }
   0x6   :  { %135 = vmatpush.msra.mxu2 %v49_v2  ;;  %136 = vmatpush.msra.mxu3 %v49_v2  ;;  %v36_v15 = vld [vmem:[%s284_s1] sm:$0xff]  ;;  %v32_v16 = vld [vmem:[%s286_s0 + $0x10] sm:$0xff]  ;;  %v31_v19 = vld [vmem:[%s286_s0 + $0x8] sm:$0xff] }
   0x7   :  { %54 = vmatpush.msra.mxu0 %v49_v2  ;;  %134 = vmatpush.msra.mxu1 %v49_v2  ;;  %v34_v17 = vld [vmem:[%s286_s0 + $0x20] sm:$0xff]  ;;  %v33_v20 = vld [vmem:[%s286_s0 + $0x18] sm:$0xff]  ;;  %v35_v21 = vld [vmem:[%s286_s0 + $0x28] sm:$0xff] }
   0x8   :  { %138 = vmatpush.msra.mxu2 %v48_v3  ;;  %139 = vmatpush.msra.mxu3 %v48_v3  ;;  %v30_v18 = vld [vmem:[%s286_s0] sm:$0xff] }
   0x9   :  { %55 = vmatpush.msra.mxu0 %v48_v3  ;;  %137 = vmatpush.msra.mxu1 %v48_v3  ;;  %v176_v22 = vld [vmem:[%s285_s2] ss:$0 sm:$0xff] }
   0xa   :  { %141 = vmatpush.msra.mxu2 %v47_v4  ;;  %142 = vmatpush.msra.mxu3 %v47_v4 }
   0xb   :  { %56 = vmatpush.msra.mxu0 %v47_v4  ;;  %140 = vmatpush.msra.mxu1 %v47_v4 }
   0xc   :  { %144 = vmatpush.msra.mxu2 %v46_v5  ;;  %145 = vmatpush.msra.mxu3 %v46_v5 }
   0xd   :  { %57 = vmatpush.msra.mxu0 %v46_v5  ;;  %143 = vmatpush.msra.mxu1 %v46_v5 }
   0xe   :  { %147 = vmatpush.msra.mxu2 %v45_v6  ;;  %148 = vmatpush.msra.mxu3 %v45_v6 }
   0xf   :  { %58 = vmatpush.msra.mxu0 %v45_v6  ;;  %146 = vmatpush.msra.mxu1 %v45_v6 }
  0x10   :  { %150 = vmatpush.msra.mxu2 %v44_v7  ;;  %151 = vmatpush.msra.mxu3 %v44_v7 }
  0x11   :  { %59 = vmatpush.msra.mxu0 %v44_v7  ;;  %149 = vmatpush.msra.mxu1 %v44_v7 }
  0x12   :  { %153 = vmatpush.msra.mxu2 %v43_v8  ;;  %154 = vmatpush.msra.mxu3 %v43_v8 }
  0x13   :  { %60 = vmatpush.msra.mxu0 %v43_v8  ;;  %152 = vmatpush.msra.mxu1 %v43_v8 }
  0x14   :  { %156 = vmatpush.msra.mxu2 %v42_v9  ;;  %157 = vmatpush.msra.mxu3 %v42_v9 }
  0x15   :  { %61 = vmatpush.msra.mxu0 %v42_v9  ;;  %155 = vmatpush.msra.mxu1 %v42_v9 }
  0x16   :  { %159 = vmatpush.msra.mxu2 %v41_v10  ;;  %160 = vmatpush.msra.mxu3 %v41_v10 }
  0x17   :  { %62 = vmatpush.msra.mxu0 %v41_v10  ;;  %158 = vmatpush.msra.mxu1 %v41_v10 }
  0x18   :  { %162 = vmatpush.msra.mxu2 %v40_v11  ;;  %163 = vmatpush.msra.mxu3 %v40_v11 }
  0x19   :  { %63 = vmatpush.msra.mxu0 %v40_v11  ;;  %161 = vmatpush.msra.mxu1 %v40_v11 }
  0x1a   :  { %165 = vmatpush.msra.mxu2 %v39_v12  ;;  %166 = vmatpush.msra.mxu3 %v39_v12 }
  0x1b   :  { %64 = vmatpush.msra.mxu0 %v39_v12  ;;  %164 = vmatpush.msra.mxu1 %v39_v12 }
  0x1c   :  { %168 = vmatpush.msra.mxu2 %v38_v13  ;;  %169 = vmatpush.msra.mxu3 %v38_v13 }
  0x1d   :  { %65 = vmatpush.msra.mxu0 %v38_v13  ;;  %167 = vmatpush.msra.mxu1 %v38_v13 }
  0x1e   :  { %171 = vmatpush.msra.mxu2 %v37_v14  ;;  %172 = vmatpush.msra.mxu3 %v37_v14 }
  0x1f   :  { %66 = vmatpush.msra.mxu0 %v37_v14  ;;  %170 = vmatpush.msra.mxu1 %v37_v14 }
  0x20   :  { %174 = vmatpush.msra.mxu2 %v36_v15  ;;  %175 = vmatpush.msra.mxu3 %v36_v15 }
  0x21   :  { %74 = vmatmul.f32.vlgmr.msra.gmra.mxu2 %v32_v16  ;;  %80 = vmatmul.f32.vlgmr.msra.gmra.mxu3 %v34_v17 }
  0x22   :  { %67 = vmatpush.msra.mxu0 %v36_v15  ;;  %173 = vmatpush.msra.mxu1 %v36_v15 }
  0x23   :  { %68 = vmatmul.f32.vlgmr.msra.gmra.mxu0 %v30_v18  ;;  %71 = vmatmul.f32.vlgmr.msra.gmra.mxu1 %v31_v19 }
  0x29   :  { %77 = vmatmul.f32.gmra.mxu2 %v33_v20  ;;  %83 = vmatmul.f32.gmra.mxu3 %v35_v21 }
  0xa0   :  { %v69_v23 = vpop.f32.mrf.mxu0  ;;  %v72_v24 = vpop.f32.mrf.mxu1 }
  0xa1   :  { %v112_v25 = vadd.f32 %v176_v22, %v69_v23  ;;  %v113_v26 = vadd.f32 %v176_v22, %v72_v24 }
  0xa3   :  { %118 = vst [vmem:[%s287_s3] sm:$0xff] %v112_v25 }
  0xa4   :  { %v75_v27 = vpop.f32.mrf.mxu2  ;;  %v81_v28 = vpop.f32.mrf.mxu3  ;;  %119 = vst [vmem:[%s287_s3 + $0x8] sm:$0xff] %v113_v26 }
  0xa5   :  { %v114_v29 = vadd.f32 %v176_v22, %v75_v27  ;;  %v116_v30 = vadd.f32 %v176_v22, %v81_v28 }
  0xa7   :  { %120 = vst [vmem:[%s287_s3 + $0x10] sm:$0xff] %v114_v29 }
  0xa8   :  { %122 = vst [vmem:[%s287_s3 + $0x20] sm:$0xff] %v116_v30 }
  0xac   :  { %v78_v31 = vpop.f32.mrf.mxu2  ;;  %v84_v32 = vpop.f32.mrf.mxu3 }
  0xad   :  { %v115_v33 = vadd.f32 %v176_v22, %v78_v31  ;;  %v117_v34 = vadd.f32 %v176_v22, %v84_v32 }
  0xaf   :  { %121 = vst [vmem:[%s287_s3 + $0x18] sm:$0xff] %v115_v33 }
  0xb0   :  { %123 = vst [vmem:[%s287_s3 + $0x28] sm:$0xff] %v117_v34 }

</bundles_post_ra>
